<compile_context>
chip_gen: v5e
topology: v5e:2x2
jax: 0.10.0
libtpu: 0.0.40
codegen_flags: <defaults>
</compile_context>

<pallas_src>
import functools

import jax
import jax.numpy as jnp
from jax.experimental import pallas as pl
from jax.experimental.pallas import tpu as pltpu

BN_EPS = 1e-5
_NEG_BIG = -1e30        # bias for padded class lanes -> exp() underflows to 0
_LANE = 128
_SUBLANE = 8


def _round_up(n, m):
    return ((n + m - 1) // m) * m


# ---------------------------------------------------------------------------
# Kernel
# ---------------------------------------------------------------------------
def _mlp_kernel(x_ref, w_in_ref, b_in_ref,
                w_hid_ref, b_hid_ref,
                w_out_ref, b_out_ref,
                o_ref, h_ref, *, n_layers, dot_dtype):
    l = pl.program_id(1)

    # ---- input layer + ReLU (once per batch tile) ---------------------------
    @pl.when(l == 0)
    def _():
        h0 = jnp.dot(x_ref[...], w_in_ref[...],
                     preferred_element_type=jnp.float32) + b_in_ref[...]
        h_ref[...] = jnp.maximum(h0, 0.0)

    # ---- hidden layer l: Linear -> ReLU ------------------------------------
    # (BatchNorm already folded into this layer's weights; Dropout in eval = id)
    h = jnp.dot(h_ref[...].astype(dot_dtype), w_hid_ref[0],
                preferred_element_type=jnp.float32) + b_hid_ref[0]
    h_ref[...] = jnp.maximum(h, 0.0)

    # ---- output layer + softmax over classes (once per batch tile) ----------
    @pl.when(l == n_layers - 1)
    def _():
        logits = jnp.dot(h_ref[...].astype(dot_dtype), w_out_ref[...],
                         preferred_element_type=jnp.float32) + b_out_ref[...]
        m = jnp.max(logits, axis=1, keepdims=True)
        e = jnp.exp(logits - m)
        denom = jnp.sum(e, axis=1, keepdims=True)
        o_ref[...] = (e * pl.reciprocal(denom, approx=False)).astype(o_ref.dtype)


# ---------------------------------------------------------------------------
# Host-side BN folding (exact in eval mode)
# ---------------------------------------------------------------------------
def _fold_batchnorm(params, n_layers, eps=BN_EPS):
    """Fold eval-mode BatchNorm1d of hidden block i into the following Linear."""
    w_hid = [params["w_hid"][i] for i in range(n_layers)]
    b_hid = [params["b_hid"][i] for i in range(n_layers)]
    w_out, b_out = params["w_out"], params["b_out"]
    for i in range(n_layers):
        scale = params["gamma"][i] * jax.lax.rsqrt(params["var"][i] + eps)
        shift = params["beta"][i] - params["mean"][i] * scale
        if i + 1 < n_layers:
            w_next, b_next = w_hid[i + 1], b_hid[i + 1]
            w_hid[i + 1] = scale[:, None] * w_next
            b_hid[i + 1] = b_next + shift @ w_next
        else:
            b_out = b_out + shift @ w_out
            w_out = scale[:, None] * w_out
    return (params["w_in"], params["b_in"],
            jnp.stack(w_hid), jnp.stack(b_hid), w_out, b_out)


# ---------------------------------------------------------------------------
# Wrapper
# ---------------------------------------------------------------------------
def neural_net_forward(x, params, *, n_layers, weight_dtype=jnp.float32,
                       batch_tile=None):
    """x: (B, input_size) -> (B, num_classes) softmax probabilities (eval mode)."""
    assert n_layers >= 1, "kernel expects at least one hidden block"
    B, input_size = x.shape
    hidden = params["w_in"].shape[1]
    num_classes = params["w_out"].shape[1]

    w_in, b_in, w_hid, b_hid, w_out, b_out = _fold_batchnorm(params, n_layers)

    # lane-dense padding of every feature axis
    in_p = _round_up(input_size, _LANE)
    h_p = _round_up(hidden, _LANE)
    c_p = _round_up(num_classes, _LANE)

    # batch tiling: 256-row tiles when possible (full MXU height on v6e/v7x)
    if batch_tile is None:
        batch_tile = 256 if B >= 256 else _round_up(B, _SUBLANE)
    b_p = _round_up(B, batch_tile)

    f32 = jnp.float32
    x_p = jnp.pad(x.astype(f32),
                  ((0, b_p - B), (0, in_p - input_size))).astype(weight_dtype)
    w_in_p = jnp.pad(w_in, ((0, in_p - input_size),
                            (0, h_p - hidden))).astype(weight_dtype)
    b_in_p = jnp.pad(b_in, ((0, 0), (0, h_p - hidden))).astype(f32)
    w_hid_p = jnp.pad(w_hid, ((0, 0), (0, h_p - hidden),
                              (0, h_p - hidden))).astype(weight_dtype)
    b_hid_p = jnp.pad(b_hid, ((0, 0), (0, h_p - hidden))).astype(f32)
    b_hid_p = b_hid_p.reshape(n_layers, 1, h_p)
    w_out_p = jnp.pad(w_out, ((0, h_p - hidden),
                              (0, c_p - num_classes))).astype(weight_dtype)
    # padded class lanes get a huge negative bias -> exp() == 0 in the softmax
    b_out_p = jnp.pad(b_out, ((0, 0), (0, c_p - num_classes)),
                      constant_values=_NEG_BIG).astype(f32)

    kernel = functools.partial(_mlp_kernel, n_layers=n_layers,
                               dot_dtype=weight_dtype)
    grid = (b_p // batch_tile, n_layers)

    # explicit VMEM budget (double-buffered blocks + scratch) so the same kernel
    # stays inside v7x's 64 MiB as well as v5e/v6e's 128 MiB
    itm = jnp.dtype(weight_dtype).itemsize
    est = (2 * (batch_tile * in_p * itm + in_p * h_p * itm + h_p * h_p * itm
                + h_p * c_p * itm + batch_tile * c_p * 4)
           + batch_tile * h_p * 4 + 8 * (h_p + c_p) * 4)
    vmem_limit = int(min(64 * 1024 * 1024, max(2 * est, 16 * 1024 * 1024)))

    out_p = pl.pallas_call(
        kernel,
        out_shape=jax.ShapeDtypeStruct((b_p, c_p), jnp.float32),
        grid=grid,
        in_specs=[
            pl.BlockSpec((batch_tile, in_p), lambda b, l: (b, 0)),   # x
            pl.BlockSpec((in_p, h_p), lambda b, l: (0, 0)),          # w_in
            pl.BlockSpec((1, h_p), lambda b, l: (0, 0)),             # b_in
            pl.BlockSpec((1, h_p, h_p), lambda b, l: (l, 0, 0)),     # w_hid[l]
            pl.BlockSpec((1, 1, h_p), lambda b, l: (l, 0, 0)),       # b_hid[l]
            pl.BlockSpec((h_p, c_p), lambda b, l: (0, 0)),           # w_out
            pl.BlockSpec((1, c_p), lambda b, l: (0, 0)),             # b_out
        ],
        out_specs=pl.BlockSpec((batch_tile, c_p), lambda b, l: (b, 0)),
        scratch_shapes=[pltpu.VMEM((batch_tile, h_p), jnp.float32)],
        compiler_params=pltpu.CompilerParams(
            dimension_semantics=("parallel", "arbitrary"),
            vmem_limit_bytes=vmem_limit),
    )(x_p, w_in_p, b_in_p, w_hid_p, b_hid_p, w_out_p, b_out_p)

    return out_p[:B, :num_classes]


# ---------------------------------------------------------------------------
# Parameter init (PyTorch-style uniform +-1/sqrt(fan_in), weights pre-transposed
# to (in, out) so the kernel computes x @ W + b directly on the MXU)
# ---------------------------------------------------------------------------
def init_params(key, input_size, hidden_size, num_classes, n_layers):
    ks = jax.random.split(key, 3)

    def lin(k, fan_in, fan_out):
        bound = 1.0 / jnp.sqrt(fan_in)
        kw, kb = jax.random.split(k)
        w = jax.random.uniform(kw, (fan_in, fan_out), jnp.float32, -bound, bound)
        b = jax.random.uniform(kb, (1, fan_out), jnp.float32, -bound, bound)
        return w, b

    w_in, b_in = lin(ks[0], input_size, hidden_size)
    w_out, b_out = lin(ks[1], hidden_size, num_classes)

    hid_keys = jax.random.split(ks[2], max(n_layers, 1))
    if n_layers:
        pairs = [lin(hid_keys[i], hidden_size, hidden_size) for i in range(n_layers)]
        w_hid = jnp.stack([p[0] for p in pairs])
        b_hid = jnp.stack([p[1][0] for p in pairs])
    else:
        w_hid = jnp.zeros((0, hidden_size, hidden_size), jnp.float32)
        b_hid = jnp.zeros((0, hidden_size), jnp.float32)

    # BatchNorm1d defaults: gamma=1, beta=0, running_mean=0, running_var=1
    gamma = jnp.ones((n_layers, hidden_size), jnp.float32)
    beta = jnp.zeros((n_layers, hidden_size), jnp.float32)
    mean = jnp.zeros((n_layers, hidden_size), jnp.float32)
    var = jnp.ones((n_layers, hidden_size), jnp.float32)

    return dict(w_in=w_in, b_in=b_in, w_hid=w_hid, b_hid=b_hid,
                gamma=gamma, beta=beta, mean=mean, var=var,
                w_out=w_out, b_out=b_out)


def _reference(x, p, n_layers):
    h = jnp.maximum(x @ p["w_in"] + p["b_in"], 0.0)
    for i in range(n_layers):
        h = jnp.maximum(h @ p["w_hid"][i] + p["b_hid"][i], 0.0)
        h = ((h - p["mean"][i]) * jax.lax.rsqrt(p["var"][i] + BN_EPS)
             * p["gamma"][i] + p["beta"][i])
    logits = h @ p["w_out"] + p["b_out"]
    return jax.nn.softmax(logits, axis=1)


if __name__ == "__main__":
    batch = 8
    input_size = 32
    hidden_size = 32
    num_classes = 10
    n_layers = 2

    key = jax.random.PRNGKey(0)
    kx, kp, k1, k2, k3, k4 = jax.random.split(key, 6)
    x = jax.random.normal(kx, (batch, input_size), jnp.float32)
    params = init_params(kp, input_size, hidden_size, num_classes, n_layers)

    # non-trivial BatchNorm running stats so the host-side folding is exercised
    params["gamma"] = 1.0 + 0.1 * jax.random.normal(k1, (n_layers, hidden_size), jnp.float32)
    params["beta"] = 0.1 * jax.random.normal(k2, (n_layers, hidden_size), jnp.float32)
    params["mean"] = 0.1 * jax.random.normal(k3, (n_layers, hidden_size), jnp.float32)
    params["var"] = jnp.abs(1.0 + 0.1 * jax.random.normal(k4, (n_layers, hidden_size), jnp.float32))

    ref = _reference(x, params, n_layers)

    # f32 path: must match the unfolded reference tightly
    out = neural_net_forward(x, params, n_layers=n_layers,
                             weight_dtype=jnp.float32)
    out = jax.block_until_ready(out)
    assert out.shape == (batch, num_classes)
    assert jnp.allclose(out, ref, atol=1e-5, rtol=1e-5)
    assert jnp.allclose(jnp.sum(out, axis=1), 1.0, atol=1e-5)

    # bf16-weight path (full MXU rate on v6e/v7x): looser tolerance vs f32 ref
    out_bf16 = neural_net_forward(x, params, n_layers=n_layers,
                                  weight_dtype=jnp.bfloat16)
    out_bf16 = jax.block_until_ready(out_bf16)
    assert out_bf16.shape == (batch, num_classes)
    assert jnp.allclose(out_bf16, ref, atol=3e-2)
    assert jnp.allclose(jnp.sum(out_bf16, axis=1), 1.0, atol=1e-3)

    print("KERNEL_OK")
</pallas_src>

<mosaic_0001>
module attributes {stable_mosaic.version = 11 : i64} {
  func.func @_mlp_kernel(%arg0: i32, %arg1: i32, %arg2: memref<8x128xf32, #tpu.memory_space<vmem>>, %arg3: memref<128x128xf32, #tpu.memory_space<vmem>>, %arg4: memref<1x128xf32, #tpu.memory_space<vmem>>, %arg5: memref<1x128x128xf32, #tpu.memory_space<vmem>>, %arg6: memref<1x1x128xf32, #tpu.memory_space<vmem>>, %arg7: memref<128x128xf32, #tpu.memory_space<vmem>>, %arg8: memref<1x128xf32, #tpu.memory_space<vmem>>, %arg9: memref<8x128xf32, #tpu.memory_space<vmem>>, %arg10: memref<8x128xf32, #tpu.memory_space<vmem>>) attributes {dimension_semantics = [#tpu.dimension_semantics<parallel>, #tpu.dimension_semantics<arbitrary>], iteration_bounds = array<i64: 1, 2>, scalar_prefetch = 0 : i64, scratch_operands = 1 : i64, tpu.core_type = #tpu.core_type<tc>, window_params = [{transform_indices = @transform_0, window_bounds = array<i64: 8, 128>}, {pipeline_mode = #tpu.pipeline_mode<synchronous>, transform_indices = @transform_1, window_bounds = array<i64: 128, 128>}, {pipeline_mode = #tpu.pipeline_mode<synchronous>, transform_indices = @transform_2, window_bounds = array<i64: 1, 128>}, {transform_indices = @transform_3, window_bounds = array<i64: 1, 128, 128>}, {transform_indices = @transform_4, window_bounds = array<i64: 1, 1, 128>}, {pipeline_mode = #tpu.pipeline_mode<synchronous>, transform_indices = @transform_5, window_bounds = array<i64: 128, 128>}, {pipeline_mode = #tpu.pipeline_mode<synchronous>, transform_indices = @transform_6, window_bounds = array<i64: 1, 128>}, {transform_indices = @transform_7, window_bounds = array<i64: 8, 128>}]} {
    %c0_i32 = arith.constant 0 : i32
    %0 = arith.cmpi eq, %arg1, %c0_i32 : i32
    %1 = arith.extui %0 : i1 to i32
    %c0_i32_0 = arith.constant 0 : i32
    %2 = arith.cmpi ne, %1, %c0_i32_0 : i32
    scf.if %2 {
      %c0_12 = arith.constant 0 : index
      %c0_13 = arith.constant 0 : index
      %17 = vector.load %arg2[%c0_12, %c0_13] : memref<8x128xf32, #tpu.memory_space<vmem>>, vector<8x128xf32>
      %c0_14 = arith.constant 0 : index
      %c0_15 = arith.constant 0 : index
      %18 = vector.load %arg3[%c0_14, %c0_15] : memref<128x128xf32, #tpu.memory_space<vmem>>, vector<128x128xf32>
      %cst_16 = arith.constant dense<0.000000e+00> : vector<8x128xf32>
      %19 = tpu.matmul %17, %18, %cst_16 {dimension_numbers = #tpu.dot_dimension_numbers<[1], [0], [0], [1], [0, 0, 1, 1], [], []>} : vector<8x128xf32>, vector<128x128xf32>, vector<8x128xf32> -> vector<8x128xf32>
      %c0_17 = arith.constant 0 : index
      %c0_18 = arith.constant 0 : index
      %20 = vector.load %arg4[%c0_17, %c0_18] : memref<1x128xf32, #tpu.memory_space<vmem>>, vector<1x128xf32>
      %21 = vector.broadcast %20 : vector<1x128xf32> to vector<8x128xf32>
      %22 = arith.addf %19, %21 : vector<8x128xf32>
      %cst_19 = arith.constant 0.000000e+00 : f32
      %23 = vector.broadcast %cst_19 : f32 to vector<8x128xf32>
      %24 = arith.maximumf %22, %23 : vector<8x128xf32>
      %c0_20 = arith.constant 0 : index
      %c0_21 = arith.constant 0 : index
      %25 = vector.load %arg10[%c0_20, %c0_21] : memref<8x128xf32, #tpu.memory_space<vmem>>, vector<8x128xf32>
      tpu.vector_store %arg10[%c0_20, %c0_21], %24 {strides = array<i32>} : memref<8x128xf32, #tpu.memory_space<vmem>>, vector<8x128xf32>,
    } else {
    }
    %c0 = arith.constant 0 : index
    %c0_1 = arith.constant 0 : index
    %3 = vector.load %arg10[%c0, %c0_1] : memref<8x128xf32, #tpu.memory_space<vmem>>, vector<8x128xf32>
    %c0_2 = arith.constant 0 : index
    %c0_3 = arith.constant 0 : index
    %c0_4 = arith.constant 0 : index
    %4 = vector.load %arg5[%c0_2, %c0_3, %c0_4] : memref<1x128x128xf32, #tpu.memory_space<vmem>>, vector<1x128x128xf32>
    %5 = vector.shape_cast %4 : vector<1x128x128xf32> to vector<128x128xf32>
    %cst = arith.constant dense<0.000000e+00> : vector<8x128xf32>
    %6 = tpu.matmul %3, %5, %cst {dimension_numbers = #tpu.dot_dimension_numbers<[1], [0], [0], [1], [0, 0, 1, 1], [], []>} : vector<8x128xf32>, vector<128x128xf32>, vector<8x128xf32> -> vector<8x128xf32>
    %c0_5 = arith.constant 0 : index
    %c0_6 = arith.constant 0 : index
    %c0_7 = arith.constant 0 : index
    %7 = vector.load %arg6[%c0_5, %c0_6, %c0_7] : memref<1x1x128xf32, #tpu.memory_space<vmem>>, vector<1x1x128xf32>
    %8 = vector.shape_cast %7 : vector<1x1x128xf32> to vector<1x128xf32>
    %9 = vector.broadcast %8 : vector<1x128xf32> to vector<8x128xf32>
    %10 = arith.addf %6, %9 : vector<8x128xf32>
    %cst_8 = arith.constant 0.000000e+00 : f32
    %11 = vector.broadcast %cst_8 : f32 to vector<8x128xf32>
    %12 = arith.maximumf %10, %11 : vector<8x128xf32>
    %c0_9 = arith.constant 0 : index
    %c0_10 = arith.constant 0 : index
    %13 = vector.load %arg10[%c0_9, %c0_10] : memref<8x128xf32, #tpu.memory_space<vmem>>, vector<8x128xf32>
    tpu.vector_store %arg10[%c0_9, %c0_10], %12 {strides = array<i32>} : memref<8x128xf32, #tpu.memory_space<vmem>>, vector<8x128xf32>,
    %c1_i32 = arith.constant 1 : i32
    %14 = arith.cmpi eq, %arg1, %c1_i32 : i32
    %15 = arith.extui %14 : i1 to i32
    %c0_i32_11 = arith.constant 0 : i32
    %16 = arith.cmpi ne, %15, %c0_i32_11 : i32
    scf.if %16 {
      %c0_12 = arith.constant 0 : index
      %c0_13 = arith.constant 0 : index
      %17 = vector.load %arg10[%c0_12, %c0_13] : memref<8x128xf32, #tpu.memory_space<vmem>>, vector<8x128xf32>
      %c0_14 = arith.constant 0 : index
      %c0_15 = arith.constant 0 : index
      %18 = vector.load %arg7[%c0_14, %c0_15] : memref<128x128xf32, #tpu.memory_space<vmem>>, vector<128x128xf32>
      %cst_16 = arith.constant dense<0.000000e+00> : vector<8x128xf32>
      %19 = tpu.matmul %17, %18, %cst_16 {dimension_numbers = #tpu.dot_dimension_numbers<[1], [0], [0], [1], [0, 0, 1, 1], [], []>} : vector<8x128xf32>, vector<128x128xf32>, vector<8x128xf32> -> vector<8x128xf32>
      %c0_17 = arith.constant 0 : index
      %c0_18 = arith.constant 0 : index
      %20 = vector.load %arg8[%c0_17, %c0_18] : memref<1x128xf32, #tpu.memory_space<vmem>>, vector<1x128xf32>
      %21 = vector.broadcast %20 : vector<1x128xf32> to vector<8x128xf32>
      %22 = arith.addf %19, %21 : vector<8x128xf32>
      %cst_19 = arith.constant dense<0xFF800000> : vector<8xf32>
      %23 = vector.multi_reduction <maximumf>, %22, %cst_19 [1] : vector<8x128xf32> to vector<8xf32>
      %24 = vector.shape_cast %23 : vector<8xf32> to vector<8x1xf32>
      %25 = vector.broadcast %24 : vector<8x1xf32> to vector<8x128xf32>
      %26 = arith.subf %22, %25 : vector<8x128xf32>
      %27 = math.exp %26 : vector<8x128xf32>
      %cst_20 = arith.constant dense<0.000000e+00> : vector<8xf32>
      %28 = vector.multi_reduction <add>, %27, %cst_20 [1] : vector<8x128xf32> to vector<8xf32>
      %29 = vector.shape_cast %28 : vector<8xf32> to vector<8x1xf32>
      %30 = tpu.reciprocal %29 : vector<8x1xf32> -> vector<8x1xf32>
      %31 = vector.broadcast %30 : vector<8x1xf32> to vector<8x128xf32>
      %32 = arith.mulf %27, %31 : vector<8x128xf32>
      %c0_21 = arith.constant 0 : index
      %c0_22 = arith.constant 0 : index
      %33 = vector.load %arg9[%c0_21, %c0_22] : memref<8x128xf32, #tpu.memory_space<vmem>>, vector<8x128xf32>
      tpu.vector_store %arg9[%c0_21, %c0_22], %32 {strides = array<i32>} : memref<8x128xf32, #tpu.memory_space<vmem>>, vector<8x128xf32>,
    } else {
    }
    return
  }
  func.func @transform_0(%arg0: i32, %arg1: i32) -> (i32, i32) {
    %c0_i32 = arith.constant 0 : i32
    %c0_i32_0 = arith.constant 0 : i32
    return %arg0, %c0_i32 : i32, i32
  }
  func.func @transform_1(%arg0: i32, %arg1: i32) -> (i32, i32) {
    %c0_i32 = arith.constant 0 : i32
    %c0_i32_0 = arith.constant 0 : i32
    %c0_i32_1 = arith.constant 0 : i32
    return %c0_i32, %c0_i32_0 : i32, i32
  }
  func.func @transform_2(%arg0: i32, %arg1: i32) -> (i32, i32) {
    %c0_i32 = arith.constant 0 : i32
    %c0_i32_0 = arith.constant 0 : i32
    %c0_i32_1 = arith.constant 0 : i32
    return %c0_i32, %c0_i32_0 : i32, i32
  }
  func.func @transform_3(%arg0: i32, %arg1: i32) -> (i32, i32, i32) {
    %c0_i32 = arith.constant 0 : i32
    %c0_i32_0 = arith.constant 0 : i32
    %c0_i32_1 = arith.constant 0 : i32
    return %arg1, %c0_i32, %c0_i32_0 : i32, i32, i32
  }
  func.func @transform_4(%arg0: i32, %arg1: i32) -> (i32, i32, i32) {
    %c0_i32 = arith.constant 0 : i32
    %c0_i32_0 = arith.constant 0 : i32
    %c0_i32_1 = arith.constant 0 : i32
    return %arg1, %c0_i32, %c0_i32_0 : i32, i32, i32
  }
  func.func @transform_5(%arg0: i32, %arg1: i32) -> (i32, i32) {
    %c0_i32 = arith.constant 0 : i32
    %c0_i32_0 = arith.constant 0 : i32
    %c0_i32_1 = arith.constant 0 : i32
    return %c0_i32, %c0_i32_0 : i32, i32
  }
  func.func @transform_6(%arg0: i32, %arg1: i32) -> (i32, i32) {
    %c0_i32 = arith.constant 0 : i32
    %c0_i32_0 = arith.constant 0 : i32
    %c0_i32_1 = arith.constant 0 : i32
    return %c0_i32, %c0_i32_0 : i32, i32
  }
  func.func @transform_7(%arg0: i32, %arg1: i32) -> (i32, i32) {
    %c0_i32 = arith.constant 0 : i32
    %c0_i32_0 = arith.constant 0 : i32
    return %arg0, %c0_i32 : i32, i32
  }
}

</mosaic_0001>

<bundles_post_ra>
// kernel: tpu_custom_call.1
= control target key start
LH: loop header
LB: loop body
LE: loop exit
PB: predicated region body
PF: predicated region fallthrough
CT: control target
= control target key end

     0   :  { %s1206_s0 = inlined_call_operand.hbm [shape: f32[8,128], index: 0, kind: input, shape index: {}]   ;;  %s1207_s1 = inlined_call_operand.hbm [shape: f32[128,128], index: 1, kind: input, shape index: {}]   ;;  %s1208_s2 = inlined_call_operand.vmem [shape: f32[1,128], index: 2, kind: input, shape index: {}]   ;;  %s1209_s3 = inlined_call_operand.hbm [shape: f32[2,128,128], index: 3, kind: input, shape index: {}]   ;;  %s1210_s4 = inlined_call_operand.vmem [shape: f32[2,1,128], index: 4, kind: input, shape index: {}]   ;;  %s1211_s5 = inlined_call_operand.hbm [shape: f32[128,128], index: 5, kind: input, shape index: {}]   ;;  %s1212_s6 = inlined_call_operand.vmem [shape: f32[1,128], index: 6, kind: input, shape index: {}]   ;;  %s1213_s7 = inlined_call_operand.hbm [shape: f32[8,128], index: 7, kind: output, shape index: {}]  }
   0x1   :  { %1214 = sst [smem:[#allocation16_spill]] %s1206_s0 }
   0x2   :  { %1215 = sst [smem:[#allocation17_spill]] %s1207_s1 }
   0x3   :  { %1216 = sst [smem:[#allocation18_spill]] %s1211_s5 }
   0x4   :  { %12 = vsyncpa [#allocation4], 0 }
   0x5   :  { %13 = vsyncpa [#allocation7], 0 }
   0x6   :  { %14 = vsyncpa [#allocation5], 0  ;;  %s1024_s24 = smov 0   ;;  %s1026_s25 = smov 0  }
   0x7   :  { %s1028_s26 = smov 0   ;;  %s1030_s27 = smov 0  }
   0x8   :  { %s1032_s28 = smov 0   ;;  %s1034_s29 = smov 0  }
   0x9 LB: > { %s1053_s30 = sadd.s32 4294967295, %s976_s29   ;;  %p114_p0 = scmp.ne.s32.totalorder %s964_s26, %s960_s25  ;;  %s976_s29 = sphi %s1034_s29, %s20_s29   ;;  %s972_s28 = sphi %s1032_s28, %s1230_s28   ;;  %s968_s27 = sphi %s1030_s27, %s1229_s27   ;;  %s964_s26 = sphi %s1028_s26, %s1228_s26   ;;  %s960_s25 = sphi %s1026_s25, %s1227_s25   ;;  %s956_s24 = sphi %s1024_s24, %s1226_s24  }
   0xa   : > { %p115_p1 = scmp.eq.s32.totalorder %s976_s29, 0  ;;  %p120_p2 = scmp.ne.s32.totalorder %s960_s25, %s956_s24 }
   0xb   : > { %p121_p3 = scmp.eq.s32.totalorder %s1053_s30, 0  ;;  %p640_p5 = scmp.ge.s32.totalorder %s976_s29, 1 }
   0xc   : > { %p1061_p4 = por %p115_p1, %p114_p0  ;;  %p225_p7 = scmp.lt.s32.totalorder %s976_s29, 3 }
   0xd   : > { %p1068_p6 = por %p121_p3, %p120_p2  ;;  %s1219_s0 = sld [smem:[#allocation16_spill]] }
   0xe   : > { %p1076_p8 = pnand %p640_p5, %p225_p7  ;;  %s978_s15 = smov [#allocation3]  }
   0xf   : > { %s241_s16 = sshll.u32 %s978_s15, 4  ;;  %p695_p10 = scmp.lt.s32.totalorder %s976_s29, 2  ;;  %s242_s16 = int_to_ptr.vmem [resolvable:$true] %s241_s16 }
  0x10   : > { %p678_p9 = pneg %p1076_p8  ;;  %s1222_s1 = sld [smem:[#allocation17_spill]] }
  0x11   : > { %p1094_p12 = pnand %p695_p10, %p1061_p4  ;;  %s979_s22 = smov [#allocation6]  }
  0x12   : > { %p1085_p11 = pnand %p678_p9, %p121_p3  ;;  %s252_s23 = sshll.u32 %s979_s22, 4  ;;  %s253_s23 = int_to_ptr.vmem [resolvable:$true] %s252_s23 }
  0x13   : > { %s239_s13 = sshll.u32 %s1219_s0, 4  ;;  %s1224_s5 = sld [smem:[#allocation18_spill]]  ;;  %s240_s13 = int_to_ptr.hbm [resolvable:$true] %s239_s13 }
  0x14   : > { %681 = dma.hbm_to_vmem [thread:$0]  (!%p1085_p11), %s240_s13, 128, %s242_s16, [#allocation4]  }
  0x15   : > { %s980_s15 = smov 128   ;;  %s981_s9 = smov 8  }
  0x16   : > { %s250_s20 = sshll.u32 %s1222_s1, 4  ;;  %s982_s18 = smov [#allocation9]   ;;  %s251_s20 = int_to_ptr.hbm [resolvable:$true] %s250_s20 }
  0x17   : > { %684 = dma.hbm_to_vmem [thread:$0]  (!%p1085_p11), %s251_s20, 2048, %s253_s23, [#allocation7], %s980_s15, %s980_s15, %s981_s9  }
  0x18   : > { %s269_s19 = sshll.u32 %s982_s18, 4  ;;  %s29_s13 = sadd.s32 1, %s972_s28  ;;  %s270_s19 = int_to_ptr.vmem [resolvable:$true] %s269_s19 }
  0x19   : > { %s267_s12 = sshll.u32 %s1224_s5, 4  ;;  %s286_s16 = sand.u32 1, %s976_s29   ;;  %s268_s12 = int_to_ptr.hbm [resolvable:$true] %s267_s12 }
  0x1a   : > { %687 = dma.hbm_to_vmem [thread:$0]  (!%p1085_p11), %s268_s12, 2048, %s270_s19, [#allocation7], %s980_s15, %s980_s15, %s981_s9  }
  0x1b   : > { %p30_p13 = scmp.ge.s32.totalorder %s29_s13, 2  ;;  %s288_s22 = sand.u32 1, %s964_s26  }
  0x1c   : > { %s659_s24 = sshll.u32 %s972_s28, 7  ;;  %s645_s11 = sshll.u32 %s288_s22, 7 }
  0x1d   : > { %s1232_s13 = smov (%p30_p13, %s29_s13), 0  ;;  %s295_s23 = scalar_lea.hbm %s1209_s3, %s659_s24 }
  0x1e   : > { %s104_s18 = ssub.s32 %s972_s28, %s1232_s13  ;;  %s296_s17 = sshll.u32 %s295_s23, 4  ;;  %s297_s17 = int_to_ptr.hbm [resolvable:$true] %s296_s17 }
  0x1f   : > { %p105_p0 = scmp.eq.s32.totalorder %s104_s18, 0  ;;  %s290_s0 = scalar_lea.vmem [#allocation8], %s645_s11 }
  0x20   : > { %s298_s12 = sshll.u32 %s290_s0, 4  ;;  %s1225_s19 = sadd.s32 1, %s964_s26  ;;  %s299_s12 = int_to_ptr.vmem [resolvable:$true] %s298_s12 }
  0x21   : > { %s1121_s1 = scalar_select %p105_p0, %s964_s26, %s1225_s19  }
  0x22   : > { %s287_s5 = scalar_lea.sflag [#allocation4], %s286_s16  ;;  %316 = sbr.rel (%p1076_p8) target bundleno = 811 (0x32b), region = 48 }
  0x23   : > { %691 = dma.hbm_to_vmem [thread:$0]  (!%p1094_p12), %s297_s17, 2048, %s299_s12, %s287_s5, %s980_s15, %s980_s15, %s981_s9  }
  0x27   : > { %935 = dma.done.wait (%p121_p3), [#allocation4], 128  }
  0x28   : > { %937 = vsyncadd (%p121_p3), [#allocation4], 4294967168 }
  0x29   : > { %939 = dma.done.wait (%p121_p3), [#allocation7], 2048  }
  0x2a   : > { %941 = vsyncadd (%p121_p3), [#allocation7], 4294965248  ;;  %s328_s0 = sand.u32 1, %s1053_s30   ;;  %s330_s5 = sand.u32 1, %s960_s25  }
  0x2b   : > { %s651_s8 = sshll.u32 %s330_s5, 7  ;;  %s329_s14 = scalar_lea.sflag [#allocation4], %s328_s0 }
  0x2c   : > { %s1137_s21 = scalar_lea.vmem [#allocation8], %s651_s8 }
  0x2d   : > { %943 = dma.done.wait (%p1068_p6), %s329_s14, 2048  }
  0x2e   : > { %945 = vsyncadd (%p1068_p6), %s329_s14, 4294965248 }
  0x2f   : > { %947 = dma.done.wait (%p121_p3), [#allocation7], 2048  }
  0x30   : > { %949 = vsyncadd (%p121_p3), [#allocation7], 4294965248  ;;  %p367_p1 = scmp.lt.s32.totalorder %s968_s27, 1  ;;  %p653_p2 = scmp.ne.s32.totalorder %s968_s27, 0 }
  0x32   : > { %s1149_s15 = scalar_select %p367_p1, %s968_s27, 1 }
  0x33   : > { %373 = sbr.rel (%p653_p2) target bundleno = 219 (0xdb), region = 68 }
  0x34   : > { %s369_s22 = scalar_lea.vmem %s1210_s4, %s1149_s15 }
  0x38   : > { %v390_v0 = vld [vmem:[#allocation6 + $0x78] sm:$0xff]  ;;  %v389_v1 = vld [vmem:[#allocation6 + $0x70] sm:$0xff]  ;;  %v388_v2 = vld [vmem:[#allocation6 + $0x68] sm:$0xff] }
  0x39   : > { %395 = vmatpush.msra.mxu0 %v390_v0  ;;  %v387_v3 = vld [vmem:[#allocation6 + $0x60] sm:$0xff]  ;;  %v386_v4 = vld [vmem:[#allocation6 + $0x58] sm:$0xff]  ;;  %v385_v5 = vld [vmem:[#allocation6 + $0x50] sm:$0xff] }
  0x3a   : > { %v384_v6 = vld [vmem:[#allocation6 + $0x48] sm:$0xff]  ;;  %v383_v7 = vld [vmem:[#allocation6 + $0x40] sm:$0xff]  ;;  %v382_v8 = vld [vmem:[#allocation6 + $0x38] sm:$0xff] }
  0x3b   : > { %396 = vmatpush.msra.mxu0 %v389_v1  ;;  %v381_v9 = vld [vmem:[#allocation6 + $0x30] sm:$0xff]  ;;  %v380_v10 = vld [vmem:[#allocation6 + $0x28] sm:$0xff]  ;;  %v379_v11 = vld [vmem:[#allocation6 + $0x20] sm:$0xff] }
  0x3c   : > { %v378_v12 = vld [vmem:[#allocation6 + $0x18] sm:$0xff]  ;;  %v377_v13 = vld [vmem:[#allocation6 + $0x10] sm:$0xff]  ;;  %v376_v14 = vld [vmem:[#allocation6 + $0x8] sm:$0xff] }
  0x3d   : > { %397 = vmatpush.msra.mxu0 %v388_v2  ;;  %v375_v15 = vld [vmem:[#allocation6] sm:$0xff]  ;;  %v374_v16 = vld [vmem:[#allocation3] sm:$0xff]  ;;  %v755_v17 = vld [vmem:[%s1208_s2] ss:$0 sm:$0xff] }
  0x3f   : > { %398 = vmatpush.msra.mxu0 %v387_v3 }
  0x41   : > { %399 = vmatpush.msra.mxu0 %v386_v4 }
  0x43   : > { %400 = vmatpush.msra.mxu0 %v385_v5 }
  0x45   : > { %401 = vmatpush.msra.mxu0 %v384_v6 }
  0x47   : > { %402 = vmatpush.msra.mxu0 %v383_v7 }
  0x49   : > { %403 = vmatpush.msra.mxu0 %v382_v8 }
  0x4b   : > { %404 = vmatpush.msra.mxu0 %v381_v9 }
  0x4d   : > { %405 = vmatpush.msra.mxu0 %v380_v10 }
  0x4f   : > { %406 = vmatpush.msra.mxu0 %v379_v11 }
  0x51   : > { %407 = vmatpush.msra.mxu0 %v378_v12 }
  0x53   : > { %408 = vmatpush.msra.mxu0 %v377_v13 }
  0x55   : > { %409 = vmatpush.msra.mxu0 %v376_v14 }
  0x57   : > { %410 = vmatpush.msra.mxu0 %v375_v15 }
  0x58   : > { %411 = vmatmul.f32.vlgmr.msra.gmra.mxu0 %v374_v16 }
  0xd5   : > { %v412_v18 = vpop.f32.mrf.mxu0 }
  0xd6   : > { %v413_v19 = vadd.f32 %v755_v17, %v412_v18 }
  0xd8   : > { %v415_v20 = vmax.f32 %v413_v19, 0.0 }
  0xda   : > { %416 = vst [vmem:[#allocation2] sm:$0xff] %v415_v20 }
  0xdb PF: > { %v433_v21 = vld [vmem:[%s1137_s21 + $0x78] sm:$0xff]  ;;  %v432_v22 = vld [vmem:[%s1137_s21 + $0x70] sm:$0xff]  ;;  %v431_v23 = vld [vmem:[%s1137_s21 + $0x68] sm:$0xff]  ;;  %p654_p3 = scmp.ne.s32.totalorder %s968_s27, 1 }
  0xdc   : > { %438 = vmatpush.msra.mxu0 %v433_v21  ;;  %v430_v24 = vld [vmem:[%s1137_s21 + $0x60] sm:$0xff]  ;;  %v429_v25 = vld [vmem:[%s1137_s21 + $0x58] sm:$0xff]  ;;  %v428_v26 = vld [vmem:[%s1137_s21 + $0x50] sm:$0xff] }
  0xdd   : > { %v427_v27 = vld [vmem:[%s1137_s21 + $0x48] sm:$0xff]  ;;  %v426_v28 = vld [vmem:[%s1137_s21 + $0x40] sm:$0xff]  ;;  %v425_v29 = vld [vmem:[%s1137_s21 + $0x38] sm:$0xff] }
  0xde   : > { %439 = vmatpush.msra.mxu0 %v432_v22  ;;  %v424_v30 = vld [vmem:[%s1137_s21 + $0x30] sm:$0xff]  ;;  %v423_v31 = vld [vmem:[%s1137_s21 + $0x28] sm:$0xff]  ;;  %v422_v32 = vld [vmem:[%s1137_s21 + $0x20] sm:$0xff] }
  0xdf   : > { %v421_v33 = vld [vmem:[%s1137_s21 + $0x18] sm:$0xff]  ;;  %v420_v34 = vld [vmem:[%s1137_s21 + $0x10] sm:$0xff]  ;;  %v419_v35 = vld [vmem:[%s1137_s21 + $0x8] sm:$0xff] }
  0xe0   : > { %440 = vmatpush.msra.mxu0 %v431_v23  ;;  %v418_v36 = vld [vmem:[%s1137_s21] sm:$0xff]  ;;  %v756_v38 = vld [vmem:[%s369_s22] ss:$0 sm:$0xff] }
  0xe1   : > { %v417_v37 = vld [vmem:[#allocation2] sm:$0xff] }
  0xe2   : > { %441 = vmatpush.msra.mxu0 %v430_v24 }
  0xe4   : > { %442 = vmatpush.msra.mxu0 %v429_v25 }
  0xe6   : > { %443 = vmatpush.msra.mxu0 %v428_v26 }
  0xe8   : > { %444 = vmatpush.msra.mxu0 %v427_v27 }
  0xea   : > { %445 = vmatpush.msra.mxu0 %v426_v28 }
  0xec   : > { %446 = vmatpush.msra.mxu0 %v425_v29 }
  0xee   : > { %447 = vmatpush.msra.mxu0 %v424_v30 }
  0xf0   : > { %448 = vmatpush.msra.mxu0 %v423_v31 }
  0xf2   : > { %449 = vmatpush.msra.mxu0 %v422_v32 }
  0xf4   : > { %450 = vmatpush.msra.mxu0 %v421_v33 }
  0xf6   : > { %451 = vmatpush.msra.mxu0 %v420_v34 }
  0xf8   : > { %452 = vmatpush.msra.mxu0 %v419_v35 }
  0xfa   : > { %453 = vmatpush.msra.mxu0 %v418_v36 }
  0xfb   : > { %454 = vmatmul.f32.vlgmr.msra.gmra.mxu0 %v417_v37 }
 0x178   : > { %v455_v39 = vpop.f32.mrf.mxu0 }
 0x179   : > { %v456_v40 = vadd.f32 %v756_v38, %v455_v39  ;;  %463 = sbr.rel (%p654_p3) target bundleno = 805 (0x325), region = 72 }
 0x17b   : > { %v458_v41 = vmax.f32 %v456_v40, 0.0 }
 0x17d   : > { %459 = vst [vmem:[#allocation2] sm:$0xff] %v458_v41 }
 0x17e   : > { %v480_v42 = vld [vmem:[#allocation9 + $0x78] sm:$0xff]  ;;  %v479_v43 = vld [vmem:[#allocation9 + $0x70] sm:$0xff]  ;;  %v478_v44 = vld [vmem:[#allocation9 + $0x68] sm:$0xff] }
 0x17f   : > { %485 = vmatpush.msra.mxu0 %v480_v42  ;;  %v477_v45 = vld [vmem:[#allocation9 + $0x60] sm:$0xff]  ;;  %v476_v46 = vld [vmem:[#allocation9 + $0x58] sm:$0xff]  ;;  %v475_v47 = vld [vmem:[#allocation9 + $0x50] sm:$0xff] }
 0x180   : > { %v474_v48 = vld [vmem:[#allocation9 + $0x48] sm:$0xff]  ;;  %v473_v49 = vld [vmem:[#allocation9 + $0x40] sm:$0xff]  ;;  %v472_v50 = vld [vmem:[#allocation9 + $0x38] sm:$0xff] }
 0x181   : > { %486 = vmatpush.msra.mxu0 %v479_v43  ;;  %v471_v51 = vld [vmem:[#allocation9 + $0x30] sm:$0xff]  ;;  %v470_v52 = vld [vmem:[#allocation9 + $0x28] sm:$0xff]  ;;  %v469_v53 = vld [vmem:[#allocation9 + $0x20] sm:$0xff] }
 0x182   : > { %v468_v54 = vld [vmem:[#allocation9 + $0x18] sm:$0xff]  ;;  %v467_v55 = vld [vmem:[#allocation9 + $0x10] sm:$0xff]  ;;  %v466_v56 = vld [vmem:[#allocation9 + $0x8] sm:$0xff] }
 0x183   : > { %487 = vmatpush.msra.mxu0 %v478_v44  ;;  %v465_v57 = vld [vmem:[#allocation9] sm:$0xff]  ;;  %v757_v59 = vld [vmem:[%s1212_s6] ss:$0 sm:$0xff] }
 0x184   : > { %v464_v58 = vld [vmem:[#allocation2] sm:$0xff] }
 0x185   : > { %488 = vmatpush.msra.mxu0 %v477_v45 }
 0x187   : > { %489 = vmatpush.msra.mxu0 %v476_v46 }
 0x189   : > { %490 = vmatpush.msra.mxu0 %v475_v47 }
 0x18b   : > { %491 = vmatpush.msra.mxu0 %v474_v48 }
 0x18d   : > { %492 = vmatpush.msra.mxu0 %v473_v49 }
 0x18f   : > { %493 = vmatpush.msra.mxu0 %v472_v50 }
 0x191   : > { %494 = vmatpush.msra.mxu0 %v471_v51 }
 0x193   : > { %495 = vmatpush.msra.mxu0 %v470_v52 }
 0x195   : > { %496 = vmatpush.msra.mxu0 %v469_v53 }
 0x197   : > { %497 = vmatpush.msra.mxu0 %v468_v54 }
 0x199   : > { %498 = vmatpush.msra.mxu0 %v467_v55 }
 0x19b   : > { %499 = vmatpush.msra.mxu0 %v466_v56 }
 0x19d   : > { %500 = vmatpush.msra.mxu0 %v465_v57 }
 0x19e   : > { %501 = vmatmul.f32.vlgmr.msra.gmra.mxu0 %v464_v58 }
 0x21b   : > { %v502_v60 = vpop.f32.mrf.mxu0 }
 0x21c   : > { %v503_v61 = vadd.f32 %v757_v59, %v502_v60 }
 0x21e   : > { %505 = vmax.xlane.f32.xlu0 %v503_v61 }
 0x291   : > { %v506_v62 = vpop.xlane.xlu0 %505 }
 0x292   : > { %v507_v63 = vsub.f32 %v503_v61, %v506_v62 }
 0x294   : > { %v508_v0 = vmul.f32 1.442695, %v507_v63 }
 0x296   : > { %758 = vpow2.f32 %v508_v0 }
 0x29c   : > { %v759_v1 = vpop.eup %758 }
 0x29d   : > { %510 = vadd.xlane.f32.xlu0 %v759_v1 }
 0x310   : > { %v511_v2 = vpop.xlane.xlu0 %510 }
 0x311   : > { %760 = vrcp.f32 %v511_v2  ;;  %v523_v6 = vand.u32 2147483648, %v511_v2  ;;  %v521_v8 = vand.u32 2147483647, %v511_v2  ;;  %vm517_vm1 = vweird.f32 %v511_v2 }
 0x313   : > { %v524_v10 = vor.u32 1.1754944e-38, %v523_v6  ;;  %vm522_vm3 = vcmp.eq.f32.partialorder %v521_v8, 8.507059e+37 }
 0x317   : > { %v761_v3 = vpop.eup %760 }
 0x318   : > { %v513_v4 = vmul.f32 %v761_v3, %v511_v2  ;;  %vm518_vm0 = vweird.f32 %v761_v3 }
 0x319   : > { %vm519_vm2 = vmor %vm517_vm1, %vm518_vm0 }
 0x31a   : > { %v514_v5 = vsub.f32 1.0, %v513_v4 }
 0x31c   : > { %v515_v7 = vmul.f32 %v761_v3, %v514_v5 }
 0x31e   : > { %v516_v9 = vadd.f32 %v761_v3, %v515_v7 }
 0x320   : > { %v520_v11 = vsel %vm519_vm2, %v761_v3, %v516_v9 }
 0x321   : > { %v525_v12 = vsel %vm522_vm3, %v524_v10, %v520_v11 }
 0x322   : > { %v526_v13 = vmul.f32 %v759_v1, %v525_v12 }
 0x324   : > { %527 = vst [vmem:[#allocation10] sm:$0xff] %v526_v13 }
 0x325 PF: > { %p699_p4 = scmp.eq.s32.totalorder %s1053_s30, 1  ;;  %s538_s12 = sshll.u32 %s1213_s7, 4  ;;  %s539_s12 = int_to_ptr.hbm [resolvable:$true] %s538_s12 }
 0x326   : > { %s983_s19 = smov [#allocation10]  }
 0x327   : > { %s536_s0 = sshll.u32 %s983_s19, 4  ;;  %s537_s0 = int_to_ptr.vmem [resolvable:$true] %s536_s0 }
 0x328   : > { %675 = dma.vmem_to_hbm [thread:$0]  (%p699_p4), %s537_s0, 128, %s539_s12, [#allocation5]  }
 0x329   : > { %951 = dma.done.wait (%p699_p4), [#allocation5], 128  }
 0x32a   : > { %953 = vsyncadd (%p699_p4), [#allocation5], 4294967168 }
 0x32b PF: > { %s20_s29 = sadd.s32 1, %s976_s29   ;;  %s1226_s24 = smov %s960_s25 }
 0x32c   : > { %p17_p5 = scmp.ge.s32.totalorder %s20_s29, 4   ;;  %s1227_s25 = smov %s964_s26 }
 0x32d   : > { %s1228_s26 = smov %s1121_s1  ;;  %s1229_s27 = smov %s972_s28 }
 0x32e   : > { %s1230_s28 = smov %s1232_s13  ;;  %19 = sbr.rel (!%p17_p5) target bundleno = 9 (0x9), region = 109 }
 0x333   :  { %552 = vsyncpa [#allocation4], 1 }
 0x334   :  { %554 = vsyncpa [#allocation4 + $0x1], 1 }
 0x335   :  { %555 = vsyncpa [#allocation7], 1 }
 0x336   :  { %556 = vsyncpa [#allocation5], 1 }
 0x337   :  { %558 = vsyncpa [#allocation5 + $0x1], 1 }

</bundles_post_ra>
